<compile_context>
chip_gen: v7x
topology: tpu7x:2x2x1
jax: 0.10.0
libtpu: 0.0.40
codegen_flags: <defaults>
</compile_context>

<pallas_src>
import functools

import jax
import jax.numpy as jnp
from jax import lax
from jax.experimental import pallas as pl
from jax.experimental.pallas import tpu as pltpu


_MIN_GRID_STEPS = 8        # keep the pipeline fed / megacore balanced
_MAX_TILE_ROWS = 2048
_MAX_TILE_LEN = 4096
_MXU_REDUCE_MAX_C = 256    # offload lane reductions to the MXU for small C


# ----------------------------------------------------------------------------
# Chip-aware budgets
# ----------------------------------------------------------------------------
def _chip_budgets():
    """Return (tile_budget_bytes, scoped_vmem_limit_bytes).

    v5e/v6e have 128 MiB VMEM per core -> allow big tiles; v7x has 64 MiB ->
    stay conservative.  Falls back to the conservative setting if the
    hardware query is unavailable.
    """
    cap = None
    try:
        info = pltpu.get_tpu_info()
        cap = getattr(info, "vmem_capacity_bytes", None)
    except Exception:
        cap = None
    if cap is not None and cap >= (100 << 20):      # v5e / v6e class (128 MiB)
        return (40 << 20, 64 << 20)
    return (12 << 20, 32 << 20)                      # v7x class / unknown


def _bytes_per_elem(itemsize):
    # 2x double-buffered native-dtype input + output, ~2 live f32 temporaries.
    return 4 * itemsize + 8


# ----------------------------------------------------------------------------
# Kernels
# ----------------------------------------------------------------------------
def _layernorm_last_kernel(x_ref, wb_ref, o_ref, *, eps, use_mxu):
    # x_ref: (tile_rows, C); wb_ref: (2, C) with row 0 = weight, row 1 = bias.
    x = x_ref[...].astype(jnp.float32)
    c = x.shape[-1]
    inv_c = 1.0 / c
    if use_mxu:
        # MXU is idle in this kernel; use it for the lane reductions instead
        # of the XLU reduce tree.  HIGHEST precision keeps f32 accuracy.
        ones = jnp.ones((c, 1), dtype=jnp.float32)
        s1 = jnp.dot(x, ones, precision=lax.Precision.HIGHEST,
                     preferred_element_type=jnp.float32)
        s2 = jnp.dot(x * x, ones, precision=lax.Precision.HIGHEST,
                     preferred_element_type=jnp.float32)
    else:
        s1 = jnp.sum(x, axis=-1, keepdims=True)
        s2 = jnp.sum(x * x, axis=-1, keepdims=True)
    mean = s1 * inv_c                                   # (tile_rows, 1)
    var = jnp.maximum(s2 * inv_c - mean * mean, 0.0)    # one-pass biased var
    inv = lax.rsqrt(var + eps)
    w = wb_ref[0:1, :].astype(jnp.float32)              # (1, C)
    b = wb_ref[1:2, :].astype(jnp.float32)
    o_ref[...] = ((x - mean) * inv * w + b).astype(o_ref.dtype)


def _layernorm_first_kernel(x_ref, wb_ref, o_ref, *, eps):
    # x_ref: (tile_b, C, tile_len); wb_ref: (C, 2) col 0 = weight, col 1 = bias.
    # Reduce over C (sublane axis); L stays on lanes -> lane-dense I/O.
    x = x_ref[...].astype(jnp.float32)
    c = x.shape[1]
    inv_c = 1.0 / c
    s1 = jnp.sum(x, axis=1, keepdims=True)              # (tile_b, 1, tile_len)
    s2 = jnp.sum(x * x, axis=1, keepdims=True)
    mean = s1 * inv_c
    var = jnp.maximum(s2 * inv_c - mean * mean, 0.0)    # one-pass biased var
    inv = lax.rsqrt(var + eps)
    w = wb_ref[:, 0:1].astype(jnp.float32)[None]        # (1, C, 1)
    b = wb_ref[:, 1:2].astype(jnp.float32)[None]
    o_ref[...] = ((x - mean) * inv * w + b).astype(o_ref.dtype)


# ----------------------------------------------------------------------------
# Tile-size selection (memory-bound; never collapse to a 1-step grid)
# ----------------------------------------------------------------------------
def _choose_tile_rows(rows, C, itemsize, budget):
    if rows <= 8:
        return rows
    per_row = C * _bytes_per_elem(itemsize)
    budget_rows = max(8, budget // per_row)
    steps_cap = max(8, rows // _MIN_GRID_STEPS)     # keep >= ~8 grid steps
    t = min(budget_rows, steps_cap, _MAX_TILE_ROWS)
    return max(8, (t // 8) * 8)                     # sublane multiple of 8


def _choose_tiles_first(B, C, L, itemsize, budget):
    per_col = C * _bytes_per_elem(itemsize)         # one (C,) lane column
    budget_len = max(128, (budget // per_col) // 128 * 128)

    if L <= 128:
        tile_len = L                                # too short to split on lanes
    elif B >= _MIN_GRID_STEPS and L <= min(budget_len, _MAX_TILE_LEN):
        tile_len = L                                # batch axis supplies the steps
    else:
        want_l_steps = max(1, -(-_MIN_GRID_STEPS // max(1, B)))   # ceil(8/B)
        tile_len = max(128, min(budget_len, _MAX_TILE_LEN,
                                (L // want_l_steps) // 128 * 128))
        if tile_len >= L:
            tile_len = L

    steps_l = -(-L // tile_len)                     # cdiv
    budget_b = max(1, budget // (per_col * tile_len))
    want_b_steps = max(1, -(-_MIN_GRID_STEPS // steps_l))
    steps_b = max(1, B // want_b_steps)
    tile_b = max(1, min(B, budget_b, steps_b))
    return tile_b, tile_len


# ----------------------------------------------------------------------------
# Wrappers
# ----------------------------------------------------------------------------
def layernorm_channels_last(x, weight, bias, eps, tile_rows=None):
    """x: (B, L, C); normalize over C (== F.layer_norm over last dim)."""
    B, L, C = x.shape
    rows = B * L
    x2d = x.reshape(rows, C)                        # metadata-only for contiguous x
    tile_budget, vmem_limit = _chip_budgets()
    if tile_rows is None:
        tile_rows = _choose_tile_rows(rows, C, x.dtype.itemsize, tile_budget)
    wb = jnp.stack([weight.astype(jnp.float32),
                    bias.astype(jnp.float32)], axis=0)          # (2, C)
    use_mxu = C <= _MXU_REDUCE_MAX_C

    out = pl.pallas_call(
        functools.partial(_layernorm_last_kernel, eps=eps, use_mxu=use_mxu),
        out_shape=jax.ShapeDtypeStruct((rows, C), x.dtype),
        grid_spec=pltpu.PrefetchScalarGridSpec(
            num_scalar_prefetch=0,
            grid=(pl.cdiv(rows, tile_rows),),
            in_specs=[
                pl.BlockSpec((tile_rows, C), lambda i: (i, 0)),
                pl.BlockSpec((2, C), lambda i: (0, 0)),
            ],
            out_specs=pl.BlockSpec((tile_rows, C), lambda i: (i, 0)),
        ),
        compiler_params=pltpu.CompilerParams(
            dimension_semantics=("parallel",),
            vmem_limit_bytes=vmem_limit),
    )(x2d, wb)
    return out.reshape(B, L, C)


def layernorm_channels_first(x, weight, bias, eps, tile_len=None, tile_b=None):
    """x: (B, C, L); normalize over C, in-layout (no HBM transposes)."""
    B, C, L = x.shape
    tile_budget, vmem_limit = _chip_budgets()
    auto_b, auto_len = _choose_tiles_first(B, C, L, x.dtype.itemsize, tile_budget)
    if tile_len is None:
        tile_len = auto_len
    if tile_b is None:
        tile_b = auto_b
    wb = jnp.stack([weight.astype(jnp.float32),
                    bias.astype(jnp.float32)], axis=1)          # (C, 2)

    out = pl.pallas_call(
        functools.partial(_layernorm_first_kernel, eps=eps),
        out_shape=jax.ShapeDtypeStruct((B, C, L), x.dtype),
        grid_spec=pltpu.PrefetchScalarGridSpec(
            num_scalar_prefetch=0,
            grid=(pl.cdiv(B, tile_b), pl.cdiv(L, tile_len)),
            in_specs=[
                pl.BlockSpec((tile_b, C, tile_len), lambda b, l: (b, 0, l)),
                pl.BlockSpec((C, 2), lambda b, l: (0, 0)),
            ],
            out_specs=pl.BlockSpec((tile_b, C, tile_len), lambda b, l: (b, 0, l)),
        ),
        compiler_params=pltpu.CompilerParams(
            dimension_semantics=("parallel", "parallel"),
            vmem_limit_bytes=vmem_limit),
    )(x, wb)
    return out


class LayerNormPallas:
    """Mirror of the PyTorch LayerNorm module (channels_last / channels_first)."""

    def __init__(self, normalized_shape: int, eps: float = 1e-6,
                 data_format: str = "channels_last"):
        if data_format not in ("channels_last", "channels_first"):
            raise NotImplementedError
        self.normalized_shape = normalized_shape
        self.eps = eps
        self.data_format = data_format
        # nn.Parameter(torch.ones / torch.zeros)
        self.weight = jnp.ones((normalized_shape,), dtype=jnp.float32)
        self.bias = jnp.zeros((normalized_shape,), dtype=jnp.float32)

    def __call__(self, x):
        C = self.normalized_shape
        if self.data_format == "channels_last":
            assert x.shape[-1] == C
            return layernorm_channels_last(x, self.weight, self.bias, self.eps)
        else:
            assert x.shape[1] == C
            return layernorm_channels_first(x, self.weight, self.bias, self.eps)


# ----------------------------------------------------------------------------
# References (pure JAX)
# ----------------------------------------------------------------------------
def _reference_channels_last(x, w, b, eps):
    mean = jnp.mean(x, axis=-1, keepdims=True)
    var = jnp.mean((x - mean) ** 2, axis=-1, keepdims=True)
    return (x - mean) / jnp.sqrt(var + eps) * w + b


def _reference_channels_first(x, w, b, eps):
    u = jnp.mean(x, axis=1, keepdims=True)
    s = jnp.mean((x - u) ** 2, axis=1, keepdims=True)
    xn = (x - u) / jnp.sqrt(s + eps)
    return w[:, None] * xn + b[:, None]


if __name__ == "__main__":
    key = jax.random.PRNGKey(0)
    k1, k2, k3, k4, k5, k6 = jax.random.split(key, 6)
    eps = 1e-6
    B, L, C = 2, 8, 32

    # Non-trivial affine parameters to exercise the weight/bias path.
    w = 1.0 + 0.1 * jax.random.normal(k3, (C,), dtype=jnp.float32)
    b = 0.1 * jax.random.normal(k4, (C,), dtype=jnp.float32)

    # channels_last: (B, L, C) — exercises the MXU-reduction path (C <= 256)
    x_last = jax.random.normal(k1, (B, L, C), dtype=jnp.float32)
    ln_last = LayerNormPallas(C, eps=eps, data_format="channels_last")
    ln_last.weight, ln_last.bias = w, b
    y_last = jax.block_until_ready(ln_last(x_last))
    ref_last = _reference_channels_last(x_last, w, b, eps)
    assert jnp.allclose(y_last, ref_last, atol=1e-4, rtol=1e-4)

    # channels_first: (B, C, L) — in-layout kernel, no transposes
    x_first = jax.random.normal(k2, (B, C, L), dtype=jnp.float32)
    ln_first = LayerNormPallas(C, eps=eps, data_format="channels_first")
    ln_first.weight, ln_first.bias = w, b
    y_first = jax.block_until_ready(ln_first(x_first))
    ref_first = _reference_channels_first(x_first, w, b, eps)
    assert jnp.allclose(y_first, ref_first, atol=1e-4, rtol=1e-4)

    # Masked edge blocks (non-divisible extents) with forced small tiles.
    x_edge = jax.random.normal(k5, (2, 10, C), dtype=jnp.float32)   # rows=20, tile=8
    y_edge = jax.block_until_ready(
        layernorm_channels_last(x_edge, w, b, eps, tile_rows=8))
    assert jnp.allclose(y_edge, _reference_channels_last(x_edge, w, b, eps),
                        atol=1e-4, rtol=1e-4)

    x_edge_cf = jax.random.normal(k6, (2, C, 200), dtype=jnp.float32)  # L=200, tile=128
    y_edge_cf = jax.block_until_ready(
        layernorm_channels_first(x_edge_cf, w, b, eps, tile_len=128, tile_b=1))
    assert jnp.allclose(y_edge_cf, _reference_channels_first(x_edge_cf, w, b, eps),
                        atol=1e-4, rtol=1e-4)

    print("KERNEL_OK")
</pallas_src>

<mosaic_0001>
module attributes {stable_mosaic.version = 11 : i64} {
  func.func @_layernorm_last_kernel(%arg0: i32, %arg1: memref<8x32xf32, #tpu.memory_space<vmem>>, %arg2: memref<2x32xf32, #tpu.memory_space<vmem>>, %arg3: memref<8x32xf32, #tpu.memory_space<vmem>>) attributes {dimension_semantics = [#tpu.dimension_semantics<parallel>], iteration_bounds = array<i64: 2>, scalar_prefetch = 0 : i64, scratch_operands = 0 : i64, tpu.core_type = #tpu.core_type<tc>, window_params = [{transform_indices = @transform_0, window_bounds = array<i64: 8, 32>}, {pipeline_mode = #tpu.pipeline_mode<synchronous>, transform_indices = @transform_1, window_bounds = array<i64: 2, 32>}, {transform_indices = @transform_2, window_bounds = array<i64: 8, 32>}]} {
    %c0 = arith.constant 0 : index
    %c0_0 = arith.constant 0 : index
    %0 = vector.load %arg1[%c0, %c0_0] : memref<8x32xf32, #tpu.memory_space<vmem>>, vector<8x32xf32>
    %cst = arith.constant 1.000000e+00 : f32
    %1 = vector.broadcast %cst : f32 to vector<32x1xf32>
    %cst_1 = arith.constant dense<0.000000e+00> : vector<8x1xf32>
    %2 = tpu.matmul %0, %1, %cst_1 {dimension_numbers = #tpu.dot_dimension_numbers<[1], [0], [0], [1], [0, 0, 1, 1], [], []>, precision = #tpu.contract_precision<fp32>} : vector<8x32xf32>, vector<32x1xf32>, vector<8x1xf32> -> vector<8x1xf32>
    %3 = arith.mulf %0, %0 : vector<8x32xf32>
    %cst_2 = arith.constant dense<0.000000e+00> : vector<8x1xf32>
    %4 = tpu.matmul %3, %1, %cst_2 {dimension_numbers = #tpu.dot_dimension_numbers<[1], [0], [0], [1], [0, 0, 1, 1], [], []>, precision = #tpu.contract_precision<fp32>} : vector<8x32xf32>, vector<32x1xf32>, vector<8x1xf32> -> vector<8x1xf32>
    %cst_3 = arith.constant 3.125000e-02 : f32
    %5 = vector.broadcast %cst_3 : f32 to vector<8x1xf32>
    %6 = arith.mulf %2, %5 : vector<8x1xf32>
    %cst_4 = arith.constant 3.125000e-02 : f32
    %7 = vector.broadcast %cst_4 : f32 to vector<8x1xf32>
    %8 = arith.mulf %4, %7 : vector<8x1xf32>
    %9 = arith.mulf %6, %6 : vector<8x1xf32>
    %10 = arith.subf %8, %9 : vector<8x1xf32>
    %cst_5 = arith.constant 0.000000e+00 : f32
    %11 = vector.broadcast %cst_5 : f32 to vector<8x1xf32>
    %12 = arith.maximumf %10, %11 : vector<8x1xf32>
    %cst_6 = arith.constant 9.99999997E-7 : f32
    %13 = vector.broadcast %cst_6 : f32 to vector<8x1xf32>
    %14 = arith.addf %12, %13 : vector<8x1xf32>
    %15 = math.rsqrt %14 : vector<8x1xf32>
    %c0_7 = arith.constant 0 : index
    %c0_8 = arith.constant 0 : index
    %16 = vector.load %arg2[%c0_7, %c0_8] : memref<2x32xf32, #tpu.memory_space<vmem>>, vector<1x32xf32>
    %c1 = arith.constant 1 : index
    %c0_9 = arith.constant 0 : index
    %17 = vector.load %arg2[%c1, %c0_9] : memref<2x32xf32, #tpu.memory_space<vmem>>, vector<1x32xf32>
    %18 = vector.broadcast %6 : vector<8x1xf32> to vector<8x32xf32>
    %19 = arith.subf %0, %18 : vector<8x32xf32>
    %20 = vector.broadcast %15 : vector<8x1xf32> to vector<8x32xf32>
    %21 = arith.mulf %19, %20 : vector<8x32xf32>
    %22 = vector.broadcast %16 : vector<1x32xf32> to vector<8x32xf32>
    %23 = arith.mulf %21, %22 : vector<8x32xf32>
    %24 = vector.broadcast %17 : vector<1x32xf32> to vector<8x32xf32>
    %25 = arith.addf %23, %24 : vector<8x32xf32>
    %c0_10 = arith.constant 0 : index
    %c0_11 = arith.constant 0 : index
    %26 = vector.load %arg3[%c0_10, %c0_11] : memref<8x32xf32, #tpu.memory_space<vmem>>, vector<8x32xf32>
    tpu.vector_store %arg3[%c0_10, %c0_11], %25 {strides = array<i32>} : memref<8x32xf32, #tpu.memory_space<vmem>>, vector<8x32xf32>,
    return
  }
  func.func @transform_0(%arg0: i32) -> (i32, i32) {
    %c0_i32 = arith.constant 0 : i32
    %c0_i32_0 = arith.constant 0 : i32
    return %arg0, %c0_i32 : i32, i32
  }
  func.func @transform_1(%arg0: i32) -> (i32, i32) {
    %c0_i32 = arith.constant 0 : i32
    %c0_i32_0 = arith.constant 0 : i32
    %c0_i32_1 = arith.constant 0 : i32
    return %c0_i32, %c0_i32_0 : i32, i32
  }
  func.func @transform_2(%arg0: i32) -> (i32, i32) {
    %c0_i32 = arith.constant 0 : i32
    %c0_i32_0 = arith.constant 0 : i32
    return %arg0, %c0_i32 : i32, i32
  }
}

</mosaic_0001>

<bundles_post_ra>
// kernel: tpu_custom_call.1
= control target key start
LH: loop header
LB: loop body
LE: loop exit
PB: predicated region body
PF: predicated region fallthrough
CT: control target
= control target key end

     0   :  { %7 = vsyncpa [#allocation3], 0  ;;  %s1760_s0 = inlined_call_operand.hbm [shape: f32[16,32], index: 0, kind: input, shape index: {}]   ;;  %s1761_s1 = inlined_call_operand.vmem [shape: f32[2,32], index: 1, kind: input, shape index: {}]   ;;  %s1762_s2 = inlined_call_operand.hbm [shape: f32[16,32], index: 2, kind: output, shape index: {}]  }
   0x1   :  { %9 = vsyncpa [#allocation3 + $0x1], 0 }
   0x2   :  { %10 = vsyncpa [#allocation4], 0 }
   0x3   :  { %12 = vsyncpa [#allocation4 + $0x1], 0  ;;  %s1520_s9 = smov 0   ;;  %s1522_s10 = smov 0  }
   0x4   :  { %s1524_s11 = smov 0   ;;  %s1526_s12 = smov 0  }
   0x5 LB: > { %s1541_s13 = sadd.s32 4294967295, %s1496_s12   ;;  %s1150_s14 = sadd.s32 4294967294, %s1496_s12   ;;  %s1496_s12 = sphi %s1526_s12, %s1777_s12   ;;  %s1492_s11 = sphi %s1524_s11, %s1776_s11   ;;  %s1488_s10 = sphi %s1522_s10, %s1775_s10   ;;  %s1484_s9 = sphi %s1520_s9, %s1774_s9  }
   0x6   : > { %s1545_s15 = sadd.s32 1, %s1496_s12   ;;  %s25_s16 = sadd.s32 1, %s1492_s11 }
   0x7   : > { %s22_s17 = ssub.s32 %s1496_s12, %s1545_s15  ;;  %p32_p0 = scmp.ne.s32.totalorder %s1492_s11, %s1488_s10 }
   0x8   : > { %p23_p1 = scmp.eq.s32.totalorder %s22_s17, 0  ;;  %p33_p2 = scmp.eq.s32.totalorder %s1496_s12, 0 }
   0x9   : > { %p38_p3 = scmp.ne.s32.totalorder %s1488_s10, %s1484_s9  ;;  %p39_p4 = scmp.eq.s32.totalorder %s1541_s13, 0 }
   0xa   : > { %s1557_s18 = scalar_select %p23_p1, %s1492_s11, %s25_s16  }
   0xb   : > { %p1559_p5 = por %p33_p2, %p32_p0  ;;  %p1563_p6 = por %p39_p4, %p38_p3 }
   0xc   : > { %p83_p7 = scmp.eq.s32.totalorder %s1541_s13, 1  ;;  %p89_p8 = scmp.eq.s32.totalorder %s1150_s14, 1 }
   0xd   : > { %p1358_p10 = scmp.lt.s32.totalorder %s1496_s12, 2  ;;  %s112_s23 = sand.u32 1, %s1492_s11  }
   0xe   : > { %p1570_p11 = por %p83_p7, %p32_p0  ;;  %p1574_p12 = por %p89_p8, %p38_p3 }
   0xf   : > { %s1154_s24 = sshll.u32 %s1496_s12, 7  ;;  %s1153_s25 = sshll.u32 %s112_s23, 3 }
  0x10   : > { %s1766_s21 = scalar_select %p1570_p11, 1, 0 }
  0x11   : > { %s1767_s22 = scalar_select %p1574_p12, 1, 0 }
  0x12   : > { %s1583_s28 = scalar_lea.hbm %s1760_s0, %s1154_s24  ;;  %s116_s29 = scalar_lea.vmem [#allocation2], %s1153_s25 }
  0x13   : > { %s123_s30 = sshll.u32 %s116_s29, 4  ;;  %p1587_p13 = pnand %p1358_p10, %p1559_p5  ;;  %s1591_s30 = int_to_ptr.vmem [resolvable:$true] %s123_s30 }
  0x14   : > { %s113_s4 = scalar_lea.sflag [#allocation3], %s112_s23  ;;  %s1400_s5 = scalar_lea.hbm %s1583_s28, 128 }
  0x15   : > { %p1401_p2 = scmp.ne.s32.totalorder %s1583_s28, %s1400_s5  ;;  %p1402_p3 = pneg %p1587_p13 }
  0x16   : > { %s1405_s8 = scalar_lea.hbm %s1760_s0, 256  ;;  %p1406_p5 = scmp.lt.u32.totalorder %s1583_s28, %s1760_s0 }
  0x17   : > { %p1403_p4 = pnand %p1402_p3, %p1401_p2  ;;  %p1407_p8 = scmp.lt.u32.totalorder %s1405_s8, %s1400_s5 }
  0x18   : > { %p1409_p9 = scmp.lt.u32.totalorder %s1400_s5, %s1583_s28 }
  0x19   : > { %p1404_p7 = pneg %p1403_p4  ;;  %p1408_p10 = por %p1407_p8, %p1406_p5 }
  0x1b   : > { %p1410_p0 = por %p1409_p9, %p1408_p10 }
  0x1d   : > { %p1411_p1 = pnand %p1410_p0, %p1404_p7 }
  0x1f   : > { %1414 = shalt.err (!%p1411_p1)
}
  0x20   : > { %s1415_s17 = scalar_lea.vmem %s1591_s30, 128  ;;  %s1498_s19 = smov [#allocation2]  }
  0x21   : > { %p1416_p2 = scmp.ne.s32.totalorder %s1591_s30, %s1415_s17  ;;  %s1420_s23 = sshll.u32 %s1498_s19, 4  ;;  %s1421_s23 = int_to_ptr.vmem [resolvable:$false] %s1420_s23 }
  0x22   : > { %s1422_s24 = scalar_lea.vmem %s1421_s23, 256  ;;  %p1423_p11 = scmp.lt.s32.totalorder %s1591_s30, %s1421_s23 }
  0x23   : > { %p1418_p4 = pnand %p1416_p2, %p1402_p3  ;;  %p1424_p5 = scmp.lt.s32.totalorder %s1422_s24, %s1415_s17 }
  0x25   : > { %p1419_p12 = pneg %p1418_p4  ;;  %p1425_p8 = por %p1424_p5, %p1423_p11 }
  0x27   : > { %p1426_p9 = pnand %p1425_p8, %p1419_p12 }
  0x29   : > { %1429 = shalt.err (!%p1426_p9)
}
  0x2a   : > { %1353 = dma.hbm_to_vmem [thread:$0]  (!%p1587_p13), %s1583_s28, 128, %s1591_s30, %s113_s4  }
  0x2b   : > { %p1769_p0 = scmp.lt.s32.totalorder %s1496_s12, 3  ;;  %p1770_p1 = scmp.ge.s32.totalorder %s1496_s12, 1 }
  0x2d   : > { %p129_p3 = pnand %p1770_p1, %p1769_p0 }
  0x2e   : > { %s1625_s25 = sand.u32 (!%p129_p3), 1, %s1488_s10  }
  0x2f   : > { %132 = sbr.rel (%p129_p3) target bundleno = 489 (0x1e9), region = 28  ;;  %s1156_s26 = sshll.u32 (!%p129_p3), %s1625_s25, 3 }
  0x30   : > { %s135_s27 = scalar_lea.sflag (!%p129_p3), [#allocation3], %s1625_s25  ;;  %s138_s29 = scalar_lea.vmem (!%p129_p3), [#allocation2], %s1156_s26 }
  0x36   : > { %1475 = dma.done.wait (%p1563_p6), %s135_s27, 128  }
  0x37   : > { %1477 = vsyncadd (%p1563_p6), %s135_s27, 4294967168  ;;  %v1499_v0 = vmov 0.0|0.0   ;;  %v1500_v1 = vmov 1.0|1.0   ;;  %vm1501_vm0 = vmmov 0   ;;  %v1502_v2 = vmov 0.0  }
  0x38   : > { %1302 = vmatprep.subr.bf16.mxu0 %v1499_v0  ;;  %1314 = vmatprep.subr.bf16.mxu1 %v1499_v0  ;;  %vm160_vm1 = vcmask 261120   ;;  %v1648_v3 = vld [vmem:[%s138_s29] sm:$0xff]  ;;  %v1503_v17 = vmov 0   ;;  %s1161_s4 = sshll.u32 %s1541_s13, 7  ;;  %s158_s5 = scalar_lea.vmem [#allocation5], %s1156_s26 }
  0x39   : > { %1303 = vmatpush3.bf16.msra.mxu0 %v1500_v1  ;;  %1315 = vmatpush3.bf16.msra.mxu1 %v1500_v1  ;;  %v162_v4 = vsel %vm160_vm1, %v1648_v3, 0  ;;  %v597_v5 = vmul.f32 %v1648_v3, %v1648_v3  ;;  %v1158_v31 = vld [vmem:[%s1761_s1] ss:$0 sm:$0xff]  ;;  %v1159_v34 = vld [vmem:[%s1761_s1 + $0x1] ss:$0 sm:$0xff]  ;;  %s1080_s6 = sshll.u32 %s158_s5, 4  ;;  %s1715_s14 = scalar_lea.hbm %s1762_s2, %s1161_s4  ;;  %s1717_s6 = int_to_ptr.vmem [resolvable:$true] %s1080_s6 }
  0x3a   : > { %1304 = vmatprep.subr.bf16.mxu0 %v1499_v0  ;;  %1316 = vmatprep.subr.bf16.mxu1 %v1499_v0  ;;  %v229_v6 = vand.u32 4294901760, %v162_v4  ;;  %s1067_s16 = scalar_lea.sflag [#allocation4], %s1625_s25  ;;  %s1430_s17 = scalar_lea.vmem %s1717_s6, 128 }
  0x3b   : > { %1214 = vmatprep.mubr.msk.f32.mxu0 %vm1501_vm0, %v1502_v2  ;;  %1262 = vmatprep.mubr.msk.f32.mxu1 %vm1501_vm0, %v1502_v2  ;;  %v599_v7 = vsel %vm160_vm1, %v597_v5, 0  ;;  %p1431_p6 = scmp.ne.s32.totalorder %s1717_s6, %s1430_s17  ;;  %p1771_p11 = scmp.ne.s32.totalorder %s1766_s21, 0 }
  0x3c   : > { %v230_v8 = vsub.f32 %v162_v4, %v229_v6  ;;  %v666_v9 = vand.u32 4294901760, %v599_v7  ;;  %1397 = vset.pattern.permute.xlu0 %v1503_v17  ;;  %s1504_s13 = smov [#allocation5]  }
  0x3d   : > { %1305 = vmatpush3.bf16.msra.mxu0 %v1500_v1  ;;  %1317 = vmatpush3.bf16.msra.mxu1 %v1500_v1  ;;  %p1432_p12 = pnand %p1431_p6, %p1771_p11  ;;  %s1434_s19 = sshll.u32 %s1504_s13, 4  ;;  %s1435_s19 = int_to_ptr.vmem [resolvable:$false] %s1434_s19 }
  0x3e   : > { %1217 = vmatprep.subr.mxu0 %v1502_v2  ;;  %1265 = vmatprep.subr.mxu1 %v1502_v2  ;;  %v231_v10 = vand.u32 4294901760, %v230_v8  ;;  %v667_v11 = vsub.f32 %v599_v7, %v666_v9  ;;  %s1436_s23 = scalar_lea.vmem %s1435_s19, 256  ;;  %p1437_p7 = scmp.lt.s32.totalorder %s1717_s6, %s1435_s19 }
  0x3f   : > { %p1433_p13 = pneg %p1432_p12  ;;  %p1438_p10 = scmp.lt.s32.totalorder %s1436_s23, %s1430_s17 }
  0x40   : > { %v232_v12 = vsub.f32 %v230_v8, %v231_v10  ;;  %v668_v13 = vand.u32 4294901760, %v667_v11 }
  0x41   : > { %p1439_p2 = por %p1438_p10, %p1437_p7 }
  0x42   : > { %v233_v14 = vand.u32 4294901760, %v232_v12  ;;  %v669_v15 = vsub.f32 %v667_v11, %v668_v13 }
  0x43   : > { %p1440_p4 = pnand %p1439_p2, %p1433_p13 }
  0x44   : > { %1215 = vmatmul.mubr.f32.vlgmr.msra.gmra.mrb[0].mxu0 %v233_v14  ;;  %v670_v16 = vand.u32 4294901760, %v669_v15 }
  0x45   : > { %1218 = vmatpush3.msra.mxu0 %v1502_v2  ;;  %1219 = vmatprep.mubr.msk.f32.mxu0 %vm1501_vm0, %v1502_v2 }
  0x46   : > { %1263 = vmatmul.mubr.f32.vlgmr.msra.gmra.mrb[0].mxu1 %v670_v16  ;;  %1222 = vmatprep.subr.mxu0 %v1502_v2 }
  0x47   : > { %1266 = vmatpush3.msra.mxu1 %v1502_v2  ;;  %1267 = vmatprep.mubr.msk.f32.mxu1 %vm1501_vm0, %v1502_v2 }
  0x48   : > { %1270 = vmatprep.subr.mxu1 %v1502_v2 }
  0x4c   : > { %1220 = vmatmul.mubr.f32.vlgmr.msra.gmra.mrb[0].mxu0 %v229_v6 }
  0x4d   : > { %1223 = vmatpush3.msra.mxu0 %v1502_v2  ;;  %1224 = vmatprep.mubr.msk.f32.mxu0 %vm1501_vm0, %v1502_v2 }
  0x4e   : > { %1268 = vmatmul.mubr.f32.vlgmr.msra.gmra.mrb[0].mxu1 %v666_v9  ;;  %1306 = vmatprep.subr.bf16.mxu0 %v1499_v0 }
  0x4f   : > { %1271 = vmatpush3.msra.mxu1 %v1502_v2  ;;  %1272 = vmatprep.mubr.msk.f32.mxu1 %vm1501_vm0, %v1502_v2 }
  0x50   : > { %1318 = vmatprep.subr.bf16.mxu1 %v1499_v0 }
  0x54   : > { %1225 = vmatmul.mubr.f32.vlgmr.msra.gmra.mrb[0].mxu0 %v230_v8 }
  0x55   : > { %1307 = vmatpush3.bf16.msra.mxu0 %v1500_v1  ;;  %1235 = vmatprep.mubr.msk.f32.mxu0 %vm1501_vm0, %v1502_v2 }
  0x56   : > { %1273 = vmatmul.mubr.f32.vlgmr.msra.gmra.mrb[0].mxu1 %v667_v11  ;;  %1308 = vmatprep.subr.bf16.mxu0 %v1499_v0 }
  0x57   : > { %1319 = vmatpush3.bf16.msra.mxu1 %v1500_v1  ;;  %1283 = vmatprep.mubr.msk.f32.mxu1 %vm1501_vm0, %v1502_v2 }
  0x58   : > { %1320 = vmatprep.subr.bf16.mxu1 %v1499_v0 }
  0x59   : > { %1309 = vmatpush3.bf16.msra.mxu0 %v1500_v1 }
  0x5a   : > { %1238 = vmatprep.subr.mxu0 %v1502_v2 }
  0x5b   : > { %1321 = vmatpush3.bf16.msra.mxu1 %v1500_v1 }
  0x5c   : > { %1236 = vmatmul.mubr.f32.vlgmr.msra.gmra.mrb[0].mxu0 %v231_v10  ;;  %1286 = vmatprep.subr.mxu1 %v1502_v2 }
  0x5d   : > { %1239 = vmatpush3.msra.mxu0 %v1502_v2  ;;  %1240 = vmatprep.mubr.msk.f32.mxu0 %vm1501_vm0, %v1502_v2 }
  0x5e   : > { %1284 = vmatmul.mubr.f32.vlgmr.msra.gmra.mrb[0].mxu1 %v668_v13  ;;  %1310 = vmatprep.subr.bf16.mxu0 %v1499_v0 }
  0x5f   : > { %1287 = vmatpush3.msra.mxu1 %v1502_v2  ;;  %1288 = vmatprep.mubr.msk.f32.mxu1 %vm1501_vm0, %v1502_v2 }
  0x60   : > { %1322 = vmatprep.subr.bf16.mxu1 %v1499_v0 }
  0x64   : > { %1241 = vmatmul.mubr.f32.vlgmr.msra.gmra.mrb[0].mxu0 %v229_v6 }
  0x65   : > { %1311 = vmatpush3.bf16.msra.mxu0 %v1500_v1  ;;  %1251 = vmatprep.mubr.msk.f32.mxu0 %vm1501_vm0, %v1502_v2 }
  0x66   : > { %1289 = vmatmul.mubr.f32.vlgmr.msra.gmra.mrb[0].mxu1 %v666_v9  ;;  %1312 = vmatprep.subr.bf16.mxu0 %v1499_v0 }
  0x67   : > { %1323 = vmatpush3.bf16.msra.mxu1 %v1500_v1  ;;  %1299 = vmatprep.mubr.msk.f32.mxu1 %vm1501_vm0, %v1502_v2 }
  0x68   : > { %1324 = vmatprep.subr.bf16.mxu1 %v1499_v0 }
  0x69   : > { %1313 = vmatpush3.bf16.msra.mxu0 %v1500_v1 }
  0x6b   : > { %1325 = vmatpush3.bf16.msra.mxu1 %v1500_v1 }
  0x6c   : > { %1252 = vmatmul.mubr.f32.vlgmr.msra.gmra.mrb[0].mxu0 %v229_v6 }
  0x6e   : > { %1300 = vmatmul.mubr.f32.vlgmr.msra.gmra.mrb[0].mxu1 %v666_v9 }
 0x13f   : > { %v593_v18 = vpop.f32.mrb[0].mxu0 }
 0x140   : > { %v1034_v19 = vmul.f32 0.03125, %v593_v18  ;;  %v1253_v20 = vpop.f32.mrb[1].mxu0 }
 0x141   : > { %v1030_v21 = vpop.f32.mrb[0].mxu1 }
 0x142   : > { %v1036_v22 = vmul.f32 %v1034_v19, %v1034_v19  ;;  %v1035_v23 = vmul.f32 0.03125, %v1030_v21  ;;  %v1301_v24 = vpop.f32.mrb[1].mxu1  ;;  %1045 = vperm.xlu0 %1397, %v1034_v19  }
 0x144   : > { %v1037_v25 = vsub.f32 %v1035_v23, %v1036_v22 }
 0x146   : > { %v1038_v26 = vmax.f32 %v1037_v25, 0.0 }
 0x148   : > { %v1039_v27 = vadd.f32 1e-06, %v1038_v26 }
 0x14a   : > { %1398 = vrsqrt.f32 %v1039_v27 }
 0x154   : > { %v1399_v28 = vpop.eup %1398 }
 0x155   : > { %1051 = vperm.xlu0 %1397, %v1399_v28  }
 0x1c1   : > { %v1046_v29 = vpop.permute.xlu0 %1045 }
 0x1c2   : > { %v1048_v30 = vsub.f32 %v1648_v3, %v1046_v29 }
 0x1d4   : > { %v1052_v32 = vpop.permute.xlu0 %1051 }
 0x1d5   : > { %v1054_v33 = vmul.f32 %v1052_v32, %v1048_v30 }
 0x1d7   : > { %v1059_v35 = vmul.f32 %v1158_v31, %v1054_v33 }
 0x1d9   : > { %v1064_v36 = vadd.f32 %v1159_v34, %v1059_v35 }
 0x1db   : > { %1065 = vst.msk [vmem:[%s158_s5] sm:$0xff] %vm160_vm1, %v1064_v36 }
 0x1dc   : > { %1443 = shalt.err (!%p1440_p4)
}
 0x1dd   : > { %s1444_s24 = scalar_lea.hbm %s1715_s14, 128  ;;  %s1448_s27 = scalar_lea.hbm %s1762_s2, 256 }
 0x1de   : > { %p1445_p5 = scmp.ne.s32.totalorder %s1715_s14, %s1444_s24  ;;  %p1449_p0 = scmp.lt.u32.totalorder %s1715_s14, %s1762_s2 }
 0x1df   : > { %p1450_p1 = scmp.lt.u32.totalorder %s1448_s27, %s1444_s24  ;;  %p1452_p6 = scmp.lt.u32.totalorder %s1444_s24, %s1715_s14 }
 0x1e0   : > { %p1446_p8 = pnand %p1445_p5, %p1771_p11 }
 0x1e1   : > { %p1451_p3 = por %p1450_p1, %p1449_p0 }
 0x1e2   : > { %p1447_p9 = pneg %p1446_p8 }
 0x1e3   : > { %p1453_p12 = por %p1452_p6, %p1451_p3 }
 0x1e5   : > { %p1454_p13 = pnand %p1453_p12, %p1447_p9 }
 0x1e7   : > { %1457 = shalt.err (!%p1454_p13)
}
 0x1e8   : > { %1348 = dma.vmem_to_hbm [thread:$0]  (%p1771_p11), %s1717_s6, 128, %s1715_s14, %s1067_s16  }
 0x1e9 PF: > { %s1092_s28 = sand.u32 1, %s1484_s9   ;;  %p1772_p7 = scmp.ne.s32.totalorder %s1767_s22, 0 }
 0x1ea   : > { %p1773_p10 = scmp.ge.s32.totalorder %s1496_s12, 2  ;;  %s1093_s30 = scalar_lea.sflag [#allocation4], %s1092_s28 }
 0x1ec   : > { %p1355_p2 = pnand %p1773_p10, %p1772_p7 }
 0x1ee   : > { %1479 = dma.done.wait (!%p1355_p2), %s1093_s30, 128  }
 0x1ef   : > { %1481 = vsyncadd (!%p1355_p2), %s1093_s30, 4294967168  ;;  %p15_p4 = scmp.ge.s32.totalorder %s1545_s15, 4   ;;  %s1774_s9 = smov %s1488_s10 }
 0x1f0   : > { %s1775_s10 = smov %s1492_s11  ;;  %s1776_s11 = smov %s1557_s18 }
 0x1f1   : > { %s1777_s12 = smov %s1545_s15  ;;  %17 = sbr.rel (!%p15_p4) target bundleno = 5 (0x5), region = 73 }
 0x1f8   :  { %1098 = vsyncpa [#allocation3], 1 }
 0x1f9   :  { %1100 = vsyncpa [#allocation3 + $0x1], 1 }
 0x1fa   :  { %1101 = vsyncpa [#allocation4], 1 }
 0x1fb   :  { %1103 = vsyncpa [#allocation4 + $0x1], 1 }

</bundles_post_ra>
